<compile_context>
chip_gen: v6e
topology: v6e:2x2x1
jax: 0.10.0
libtpu: 0.0.40
codegen_flags: <defaults>
</compile_context>

<pallas_src>
import functools

import jax
import jax.numpy as jnp
from jax import lax
from jax.experimental import pallas as pl
from jax.experimental.pallas import tpu as pltpu


def _spatial_attention_kernel(x_ref, w_ref, b_ref, o_ref, ext_ref,
                              *, Bt, C, H, W, k, p):
    # x_ref  : (Bt, C, H*W)        VMEM input block (flattened spatial on lanes)
    # w_ref  : (2*k*k,)            SMEM conv weights, flattened (in_ch, ky, kx)
    # b_ref  : (1,)                SMEM conv bias
    # o_ref  : (Bt, H*W)           VMEM output block (one attention map / image)
    # ext_ref: (2*Bt, H*W + 2*OFF) VMEM scratch: zero-extended flat pooled maps,
    #          rows [0, Bt) = max-pool, rows [Bt, 2*Bt) = avg-pool.
    HW = H * W
    OFF = p * W + p  # flat offset of spatial element (0, 0) in the extended map

    # Channel-wise reductions (torch.max(x,1)[0], torch.mean(x,1)), kept 2-D.
    for bt in range(Bt):
        xb = x_ref[bt].astype(jnp.float32)                    # (C, HW)
        mx = jnp.max(xb, axis=0, keepdims=True)               # (1, HW)
        av = jnp.mean(xb, axis=0, keepdims=True)              # (1, HW)
        ext_ref[bt:bt + 1, OFF:OFF + HW] = mx
        ext_ref[Bt + bt:Bt + bt + 1, OFF:OFF + HW] = av

    if p > 0:
        # Zero only the p-wide flat borders (interior is rewritten every step).
        # Re-zeroed per step so the kernel stays correct when the batch grid is
        # sharded across TensorCores; it is only 2 * (2*Bt*OFF) elements.
        zpad = jnp.zeros((2 * Bt, OFF), jnp.float32)
        ext_ref[:, 0:OFF] = zpad
        ext_ref[:, OFF + HW:OFF + HW + OFF] = zpad

    # Column-validity masks, one per horizontal tap offset dx: a tap must not
    # read across a row boundary of the flattened spatial axis.
    col = lax.broadcasted_iota(jnp.int32, (1, HW), 1) % W
    masks = []
    for dx in range(k):
        d = dx - p
        masks.append(((col + d >= 0) & (col + d < W)).astype(jnp.float32))

    # 2-in / 1-out "same" conv, fully unrolled over the (2, k, k) taps.
    # Tap (dy, dx) reads ext[:, s : s + HW] with s = dy*W + dx, which equals
    # pool[h + dy - p, w + dx - p] for valid positions and zero otherwise.
    acc = jnp.full((Bt, HW), b_ref[0], dtype=jnp.float32)
    for dy in range(k):
        for dx in range(k):
            s = dy * W + dx
            tap_mx = ext_ref[0:Bt, s:s + HW]                  # (Bt, HW)
            tap_av = ext_ref[Bt:2 * Bt, s:s + HW]             # (Bt, HW)
            contrib = (w_ref[dy * k + dx] * tap_mx
                       + w_ref[k * k + dy * k + dx] * tap_av)
            acc = acc + masks[dx] * contrib

    o_ref[...] = jax.nn.sigmoid(acc).astype(o_ref.dtype)


def _pick_batch_block(B, C, HW, itemsize, *, max_bt=8,
                      budget_bytes=4 * 1024 * 1024):
    """Largest divisor of B (<= max_bt) whose input block fits the VMEM budget."""
    per_elem = max(1, C * HW * itemsize)
    cap = int(max(1, min(max_bt, budget_bytes // per_elem, B)))
    for cand in range(cap, 0, -1):
        if B % cand == 0:
            return cand
    return 1


def spatial_attention(x, weight, bias, kernel_size):
    """x: (B, C, H, W). weight: (1, 2, k, k). bias: (1,). Returns (B, C, H, W)."""
    B, C, H, W = x.shape
    k = kernel_size
    p = (k - 1) // 2
    HW = H * W
    OFF = p * W + p

    x_flat = x.reshape(B, C, HW)                       # lane-dense layout
    w_flat = weight.reshape(-1).astype(jnp.float32)    # (2*k*k,)
    b_flat = bias.reshape(-1).astype(jnp.float32)      # (1,)

    Bt = _pick_batch_block(B, C, HW, x.dtype.itemsize)
    kernel = functools.partial(_spatial_attention_kernel,
                               Bt=Bt, C=C, H=H, W=W, k=k, p=p)

    att_flat = pl.pallas_call(
        kernel,
        out_shape=jax.ShapeDtypeStruct((B, HW), x.dtype),
        grid_spec=pltpu.PrefetchScalarGridSpec(
            num_scalar_prefetch=0,
            grid=(B // Bt,),
            in_specs=[
                pl.BlockSpec((Bt, C, HW), lambda b: (b, 0, 0)),
                pl.BlockSpec(memory_space=pltpu.MemorySpace.SMEM),
                pl.BlockSpec(memory_space=pltpu.MemorySpace.SMEM),
            ],
            out_specs=pl.BlockSpec((Bt, HW), lambda b: (b, 0)),
            scratch_shapes=[pltpu.VMEM((2 * Bt, HW + 2 * OFF), jnp.float32)],
        ),
        compiler_params=pltpu.CompilerParams(
            dimension_semantics=("parallel",),
            vmem_limit_bytes=48 * 1024 * 1024,
        ),
    )(x_flat, w_flat, b_flat)

    # conv.repeat(1, C, 1, 1): broadcast the single attention map over channels
    # OUTSIDE the kernel, so the kernel's HBM writeback is 1/C of the naive one.
    return jnp.broadcast_to(att_flat.reshape(B, 1, H, W), (B, C, H, W))


def spatial_attention_ref(x, weight, bias, kernel_size):
    """Pure-JAX reference matching the PyTorch module."""
    p = (kernel_size - 1) // 2
    max_pool = jnp.max(x, axis=1, keepdims=True)
    avg_pool = jnp.mean(x, axis=1, keepdims=True)
    pool = jnp.concatenate([max_pool, avg_pool], axis=1)          # (B, 2, H, W)
    conv = lax.conv_general_dilated(
        pool, weight, window_strides=(1, 1), padding=[(p, p), (p, p)],
        dimension_numbers=("NCHW", "OIHW", "NCHW"))
    conv = conv + bias.reshape(1, 1, 1, 1)
    conv = jnp.broadcast_to(conv, x.shape)                        # repeat over C
    return jax.nn.sigmoid(conv)


if __name__ == "__main__":
    # Small shapes consistent with the module's forward.
    B, C, H, W = 2, 4, 16, 16
    kernel_size = 3  # must be odd

    key = jax.random.PRNGKey(0)
    kx, kw, kb = jax.random.split(key, 3)

    x = jax.random.normal(kx, (B, C, H, W), dtype=jnp.float32)
    # Deterministic synthetic conv parameters (shape: out=1, in=2, k, k).
    weight = 0.1 * jax.random.normal(kw, (1, 2, kernel_size, kernel_size),
                                     dtype=jnp.float32)
    bias = 0.05 * jax.random.normal(kb, (1,), dtype=jnp.float32)

    out = spatial_attention(x, weight, bias, kernel_size)
    out = jax.block_until_ready(out)

    ref = spatial_attention_ref(x, weight, bias, kernel_size)
    assert out.shape == (B, C, H, W)
    assert jnp.allclose(out, ref, atol=1e-5, rtol=1e-5), "mismatch vs reference"

    print("KERNEL_OK")
</pallas_src>

<mosaic_0001>
module attributes {stable_mosaic.version = 11 : i64} {
  func.func @_spatial_attention_kernel(%arg0: i32, %arg1: memref<2x4x256xf32, #tpu.memory_space<vmem>>, %arg2: memref<18xf32, #tpu.memory_space<smem>>, %arg3: memref<1xf32, #tpu.memory_space<smem>>, %arg4: memref<2x256xf32, #tpu.memory_space<vmem>>, %arg5: memref<4x290xf32, #tpu.memory_space<vmem>>) attributes {dimension_semantics = [#tpu.dimension_semantics<parallel>], iteration_bounds = array<i64: 1>, scalar_prefetch = 0 : i64, scratch_operands = 1 : i64, tpu.core_type = #tpu.core_type<tc>, window_params = [{transform_indices = @transform_0, window_bounds = array<i64: 2, 4, 256>}, {transform_indices = @transform_1, window_bounds = array<i64: 18>}, {transform_indices = @transform_2, window_bounds = array<i64: 1>}, {transform_indices = @transform_3, window_bounds = array<i64: 2, 256>}]} {
    %c0 = arith.constant 0 : index
    %c0_0 = arith.constant 0 : index
    %c0_1 = arith.constant 0 : index
    %0 = vector.load %arg1[%c0, %c0_0, %c0_1] : memref<2x4x256xf32, #tpu.memory_space<vmem>>, vector<1x4x256xf32>
    %1 = vector.shape_cast %0 : vector<1x4x256xf32> to vector<4x256xf32>
    %cst = arith.constant dense<0xFF800000> : vector<256xf32>
    %2 = vector.multi_reduction <maximumf>, %1, %cst [0] : vector<4x256xf32> to vector<256xf32>
    %3 = vector.shape_cast %2 : vector<256xf32> to vector<1x256xf32>
    %cst_2 = arith.constant dense<0.000000e+00> : vector<256xf32>
    %4 = vector.multi_reduction <add>, %1, %cst_2 [0] : vector<4x256xf32> to vector<256xf32>
    %5 = vector.shape_cast %4 : vector<256xf32> to vector<1x256xf32>
    %cst_3 = arith.constant 4.000000e+00 : f32
    %6 = vector.broadcast %cst_3 : f32 to vector<1x256xf32>
    %7 = arith.divf %5, %6 : vector<1x256xf32>
    %c0_4 = arith.constant 0 : index
    %c17 = arith.constant 17 : index
    %8 = vector.load %arg5[%c0_4, %c17] : memref<4x290xf32, #tpu.memory_space<vmem>>, vector<1x256xf32>
    tpu.vector_store %arg5[%c0_4, %c17], %3 {strides = array<i32>} : memref<4x290xf32, #tpu.memory_space<vmem>>, vector<1x256xf32>,
    %c2 = arith.constant 2 : index
    %c17_5 = arith.constant 17 : index
    %9 = vector.load %arg5[%c2, %c17_5] : memref<4x290xf32, #tpu.memory_space<vmem>>, vector<1x256xf32>
    tpu.vector_store %arg5[%c2, %c17_5], %7 {strides = array<i32>} : memref<4x290xf32, #tpu.memory_space<vmem>>, vector<1x256xf32>,
    %c1 = arith.constant 1 : index
    %c0_6 = arith.constant 0 : index
    %c0_7 = arith.constant 0 : index
    %10 = vector.load %arg1[%c1, %c0_6, %c0_7] : memref<2x4x256xf32, #tpu.memory_space<vmem>>, vector<1x4x256xf32>
    %11 = vector.shape_cast %10 : vector<1x4x256xf32> to vector<4x256xf32>
    %cst_8 = arith.constant dense<0xFF800000> : vector<256xf32>
    %12 = vector.multi_reduction <maximumf>, %11, %cst_8 [0] : vector<4x256xf32> to vector<256xf32>
    %13 = vector.shape_cast %12 : vector<256xf32> to vector<1x256xf32>
    %cst_9 = arith.constant dense<0.000000e+00> : vector<256xf32>
    %14 = vector.multi_reduction <add>, %11, %cst_9 [0] : vector<4x256xf32> to vector<256xf32>
    %15 = vector.shape_cast %14 : vector<256xf32> to vector<1x256xf32>
    %cst_10 = arith.constant 4.000000e+00 : f32
    %16 = vector.broadcast %cst_10 : f32 to vector<1x256xf32>
    %17 = arith.divf %15, %16 : vector<1x256xf32>
    %c1_11 = arith.constant 1 : index
    %c17_12 = arith.constant 17 : index
    %18 = vector.load %arg5[%c1_11, %c17_12] : memref<4x290xf32, #tpu.memory_space<vmem>>, vector<1x256xf32>
    tpu.vector_store %arg5[%c1_11, %c17_12], %13 {strides = array<i32>} : memref<4x290xf32, #tpu.memory_space<vmem>>, vector<1x256xf32>,
    %c3 = arith.constant 3 : index
    %c17_13 = arith.constant 17 : index
    %19 = vector.load %arg5[%c3, %c17_13] : memref<4x290xf32, #tpu.memory_space<vmem>>, vector<1x256xf32>
    tpu.vector_store %arg5[%c3, %c17_13], %17 {strides = array<i32>} : memref<4x290xf32, #tpu.memory_space<vmem>>, vector<1x256xf32>,
    %cst_14 = arith.constant 0.000000e+00 : f32
    %20 = vector.broadcast %cst_14 : f32 to vector<4x17xf32>
    %c0_15 = arith.constant 0 : index
    %c0_16 = arith.constant 0 : index
    %21 = vector.load %arg5[%c0_15, %c0_16] : memref<4x290xf32, #tpu.memory_space<vmem>>, vector<4x17xf32>
    tpu.vector_store %arg5[%c0_15, %c0_16], %20 {strides = array<i32>} : memref<4x290xf32, #tpu.memory_space<vmem>>, vector<4x17xf32>,
    %c0_17 = arith.constant 0 : index
    %c273 = arith.constant 273 : index
    %22 = vector.load %arg5[%c0_17, %c273] : memref<4x290xf32, #tpu.memory_space<vmem>>, vector<4x17xf32>
    tpu.vector_store %arg5[%c0_17, %c273], %20 {strides = array<i32>} : memref<4x290xf32, #tpu.memory_space<vmem>>, vector<4x17xf32>,
    %23 = tpu.iota {dimensions = array<i32: 1>} : vector<1x256xi32>
    %c16_i32 = arith.constant 16 : i32
    %c0_i32 = arith.constant 0 : i32
    %24 = arith.cmpi eq, %c16_i32, %c0_i32 : i32
    %c1_i32 = arith.constant 1 : i32
    %25 = arith.select %24, %c1_i32, %c16_i32 : i32
    %26 = vector.broadcast %25 : i32 to vector<1x256xi32>
    %27 = arith.remsi %23, %26 : vector<1x256xi32>
    %c0_i32_18 = arith.constant 0 : i32
    %28 = vector.broadcast %c0_i32_18 : i32 to vector<1x256xi32>
    %29 = arith.cmpi ne, %27, %28 : vector<1x256xi32>
    %c0_i32_19 = arith.constant 0 : i32
    %30 = vector.broadcast %c0_i32_19 : i32 to vector<1x256xi32>
    %31 = arith.cmpi slt, %27, %30 : vector<1x256xi32>
    %c0_i32_20 = arith.constant 0 : i32
    %32 = arith.cmpi slt, %25, %c0_i32_20 : i32
    %33 = vector.broadcast %32 : i1 to vector<1x256xi1>
    %34 = vector.broadcast %33 : vector<1x256xi1> to vector<1x256xi1>
    %35 = arith.xori %31, %34 : vector<1x256xi1>
    %36 = arith.andi %35, %29 : vector<1x256xi1>
    %37 = vector.broadcast %25 : i32 to vector<1x256xi32>
    %38 = arith.addi %27, %37 : vector<1x256xi32>
    %39 = arith.select %36, %38, %27 : vector<1x256xi1>, vector<1x256xi32>
    %c-1_i32 = arith.constant -1 : i32
    %40 = vector.broadcast %c-1_i32 : i32 to vector<1x256xi32>
    %41 = arith.addi %39, %40 : vector<1x256xi32>
    %c0_i32_21 = arith.constant 0 : i32
    %42 = vector.broadcast %c0_i32_21 : i32 to vector<1x256xi32>
    %43 = arith.cmpi sge, %41, %42 : vector<1x256xi32>
    %c-1_i32_22 = arith.constant -1 : i32
    %44 = vector.broadcast %c-1_i32_22 : i32 to vector<1x256xi32>
    %45 = arith.addi %39, %44 : vector<1x256xi32>
    %c16_i32_23 = arith.constant 16 : i32
    %46 = vector.broadcast %c16_i32_23 : i32 to vector<1x256xi32>
    %47 = arith.cmpi slt, %45, %46 : vector<1x256xi32>
    %48 = arith.andi %43, %47 : vector<1x256xi1>
    %49 = arith.extui %48 : vector<1x256xi1> to vector<1x256xi32>
    %50 = arith.sitofp %49 : vector<1x256xi32> to vector<1x256xf32>
    %c0_i32_24 = arith.constant 0 : i32
    %51 = vector.broadcast %c0_i32_24 : i32 to vector<1x256xi32>
    %52 = arith.addi %39, %51 : vector<1x256xi32>
    %c0_i32_25 = arith.constant 0 : i32
    %53 = vector.broadcast %c0_i32_25 : i32 to vector<1x256xi32>
    %54 = arith.cmpi sge, %52, %53 : vector<1x256xi32>
    %c0_i32_26 = arith.constant 0 : i32
    %55 = vector.broadcast %c0_i32_26 : i32 to vector<1x256xi32>
    %56 = arith.addi %39, %55 : vector<1x256xi32>
    %c16_i32_27 = arith.constant 16 : i32
    %57 = vector.broadcast %c16_i32_27 : i32 to vector<1x256xi32>
    %58 = arith.cmpi slt, %56, %57 : vector<1x256xi32>
    %59 = arith.andi %54, %58 : vector<1x256xi1>
    %60 = arith.extui %59 : vector<1x256xi1> to vector<1x256xi32>
    %61 = arith.sitofp %60 : vector<1x256xi32> to vector<1x256xf32>
    %c1_i32_28 = arith.constant 1 : i32
    %62 = vector.broadcast %c1_i32_28 : i32 to vector<1x256xi32>
    %63 = arith.addi %39, %62 : vector<1x256xi32>
    %c0_i32_29 = arith.constant 0 : i32
    %64 = vector.broadcast %c0_i32_29 : i32 to vector<1x256xi32>
    %65 = arith.cmpi sge, %63, %64 : vector<1x256xi32>
    %c1_i32_30 = arith.constant 1 : i32
    %66 = vector.broadcast %c1_i32_30 : i32 to vector<1x256xi32>
    %67 = arith.addi %39, %66 : vector<1x256xi32>
    %c16_i32_31 = arith.constant 16 : i32
    %68 = vector.broadcast %c16_i32_31 : i32 to vector<1x256xi32>
    %69 = arith.cmpi slt, %67, %68 : vector<1x256xi32>
    %70 = arith.andi %65, %69 : vector<1x256xi1>
    %71 = arith.extui %70 : vector<1x256xi1> to vector<1x256xi32>
    %72 = arith.sitofp %71 : vector<1x256xi32> to vector<1x256xf32>
    %c0_32 = arith.constant 0 : index
    %73 = memref.load %arg3[%c0_32] : memref<1xf32, #tpu.memory_space<smem>>
    %74 = vector.broadcast %73 : f32 to vector<2x256xf32>
    %c0_33 = arith.constant 0 : index
    %c0_34 = arith.constant 0 : index
    %75 = vector.load %arg5[%c0_33, %c0_34] : memref<4x290xf32, #tpu.memory_space<vmem>>, vector<2x256xf32>
    %c2_35 = arith.constant 2 : index
    %c0_36 = arith.constant 0 : index
    %76 = vector.load %arg5[%c2_35, %c0_36] : memref<4x290xf32, #tpu.memory_space<vmem>>, vector<2x256xf32>
    %c0_37 = arith.constant 0 : index
    %77 = memref.load %arg2[%c0_37] : memref<18xf32, #tpu.memory_space<smem>>
    %78 = vector.broadcast %77 : f32 to vector<2x256xf32>
    %79 = arith.mulf %78, %75 : vector<2x256xf32>
    %c9 = arith.constant 9 : index
    %80 = memref.load %arg2[%c9] : memref<18xf32, #tpu.memory_space<smem>>
    %81 = vector.broadcast %80 : f32 to vector<2x256xf32>
    %82 = arith.mulf %81, %76 : vector<2x256xf32>
    %83 = arith.addf %79, %82 : vector<2x256xf32>
    %84 = vector.broadcast %50 : vector<1x256xf32> to vector<2x256xf32>
    %85 = arith.mulf %84, %83 : vector<2x256xf32>
    %86 = arith.addf %74, %85 : vector<2x256xf32>
    %c0_38 = arith.constant 0 : index
    %c1_39 = arith.constant 1 : index
    %87 = vector.load %arg5[%c0_38, %c1_39] : memref<4x290xf32, #tpu.memory_space<vmem>>, vector<2x256xf32>
    %c2_40 = arith.constant 2 : index
    %c1_41 = arith.constant 1 : index
    %88 = vector.load %arg5[%c2_40, %c1_41] : memref<4x290xf32, #tpu.memory_space<vmem>>, vector<2x256xf32>
    %c1_42 = arith.constant 1 : index
    %89 = memref.load %arg2[%c1_42] : memref<18xf32, #tpu.memory_space<smem>>
    %90 = vector.broadcast %89 : f32 to vector<2x256xf32>
    %91 = arith.mulf %90, %87 : vector<2x256xf32>
    %c10 = arith.constant 10 : index
    %92 = memref.load %arg2[%c10] : memref<18xf32, #tpu.memory_space<smem>>
    %93 = vector.broadcast %92 : f32 to vector<2x256xf32>
    %94 = arith.mulf %93, %88 : vector<2x256xf32>
    %95 = arith.addf %91, %94 : vector<2x256xf32>
    %96 = vector.broadcast %61 : vector<1x256xf32> to vector<2x256xf32>
    %97 = arith.mulf %96, %95 : vector<2x256xf32>
    %98 = arith.addf %86, %97 : vector<2x256xf32>
    %c0_43 = arith.constant 0 : index
    %c2_44 = arith.constant 2 : index
    %99 = vector.load %arg5[%c0_43, %c2_44] : memref<4x290xf32, #tpu.memory_space<vmem>>, vector<2x256xf32>
    %c2_45 = arith.constant 2 : index
    %c2_46 = arith.constant 2 : index
    %100 = vector.load %arg5[%c2_45, %c2_46] : memref<4x290xf32, #tpu.memory_space<vmem>>, vector<2x256xf32>
    %c2_47 = arith.constant 2 : index
    %101 = memref.load %arg2[%c2_47] : memref<18xf32, #tpu.memory_space<smem>>
    %102 = vector.broadcast %101 : f32 to vector<2x256xf32>
    %103 = arith.mulf %102, %99 : vector<2x256xf32>
    %c11 = arith.constant 11 : index
    %104 = memref.load %arg2[%c11] : memref<18xf32, #tpu.memory_space<smem>>
    %105 = vector.broadcast %104 : f32 to vector<2x256xf32>
    %106 = arith.mulf %105, %100 : vector<2x256xf32>
    %107 = arith.addf %103, %106 : vector<2x256xf32>
    %108 = vector.broadcast %72 : vector<1x256xf32> to vector<2x256xf32>
    %109 = arith.mulf %108, %107 : vector<2x256xf32>
    %110 = arith.addf %98, %109 : vector<2x256xf32>
    %c0_48 = arith.constant 0 : index
    %c16 = arith.constant 16 : index
    %111 = vector.load %arg5[%c0_48, %c16] : memref<4x290xf32, #tpu.memory_space<vmem>>, vector<2x256xf32>
    %c2_49 = arith.constant 2 : index
    %c16_50 = arith.constant 16 : index
    %112 = vector.load %arg5[%c2_49, %c16_50] : memref<4x290xf32, #tpu.memory_space<vmem>>, vector<2x256xf32>
    %c3_51 = arith.constant 3 : index
    %113 = memref.load %arg2[%c3_51] : memref<18xf32, #tpu.memory_space<smem>>
    %114 = vector.broadcast %113 : f32 to vector<2x256xf32>
    %115 = arith.mulf %114, %111 : vector<2x256xf32>
    %c12 = arith.constant 12 : index
    %116 = memref.load %arg2[%c12] : memref<18xf32, #tpu.memory_space<smem>>
    %117 = vector.broadcast %116 : f32 to vector<2x256xf32>
    %118 = arith.mulf %117, %112 : vector<2x256xf32>
    %119 = arith.addf %115, %118 : vector<2x256xf32>
    %120 = vector.broadcast %50 : vector<1x256xf32> to vector<2x256xf32>
    %121 = arith.mulf %120, %119 : vector<2x256xf32>
    %122 = arith.addf %110, %121 : vector<2x256xf32>
    %c0_52 = arith.constant 0 : index
    %c17_53 = arith.constant 17 : index
    %123 = vector.load %arg5[%c0_52, %c17_53] : memref<4x290xf32, #tpu.memory_space<vmem>>, vector<2x256xf32>
    %c2_54 = arith.constant 2 : index
    %c17_55 = arith.constant 17 : index
    %124 = vector.load %arg5[%c2_54, %c17_55] : memref<4x290xf32, #tpu.memory_space<vmem>>, vector<2x256xf32>
    %c4 = arith.constant 4 : index
    %125 = memref.load %arg2[%c4] : memref<18xf32, #tpu.memory_space<smem>>
    %126 = vector.broadcast %125 : f32 to vector<2x256xf32>
    %127 = arith.mulf %126, %123 : vector<2x256xf32>
    %c13 = arith.constant 13 : index
    %128 = memref.load %arg2[%c13] : memref<18xf32, #tpu.memory_space<smem>>
    %129 = vector.broadcast %128 : f32 to vector<2x256xf32>
    %130 = arith.mulf %129, %124 : vector<2x256xf32>
    %131 = arith.addf %127, %130 : vector<2x256xf32>
    %132 = vector.broadcast %61 : vector<1x256xf32> to vector<2x256xf32>
    %133 = arith.mulf %132, %131 : vector<2x256xf32>
    %134 = arith.addf %122, %133 : vector<2x256xf32>
    %c0_56 = arith.constant 0 : index
    %c18 = arith.constant 18 : index
    %135 = vector.load %arg5[%c0_56, %c18] : memref<4x290xf32, #tpu.memory_space<vmem>>, vector<2x256xf32>
    %c2_57 = arith.constant 2 : index
    %c18_58 = arith.constant 18 : index
    %136 = vector.load %arg5[%c2_57, %c18_58] : memref<4x290xf32, #tpu.memory_space<vmem>>, vector<2x256xf32>
    %c5 = arith.constant 5 : index
    %137 = memref.load %arg2[%c5] : memref<18xf32, #tpu.memory_space<smem>>
    %138 = vector.broadcast %137 : f32 to vector<2x256xf32>
    %139 = arith.mulf %138, %135 : vector<2x256xf32>
    %c14 = arith.constant 14 : index
    %140 = memref.load %arg2[%c14] : memref<18xf32, #tpu.memory_space<smem>>
    %141 = vector.broadcast %140 : f32 to vector<2x256xf32>
    %142 = arith.mulf %141, %136 : vector<2x256xf32>
    %143 = arith.addf %139, %142 : vector<2x256xf32>
    %144 = vector.broadcast %72 : vector<1x256xf32> to vector<2x256xf32>
    %145 = arith.mulf %144, %143 : vector<2x256xf32>
    %146 = arith.addf %134, %145 : vector<2x256xf32>
    %c0_59 = arith.constant 0 : index
    %c32 = arith.constant 32 : index
    %147 = vector.load %arg5[%c0_59, %c32] : memref<4x290xf32, #tpu.memory_space<vmem>>, vector<2x256xf32>
    %c2_60 = arith.constant 2 : index
    %c32_61 = arith.constant 32 : index
    %148 = vector.load %arg5[%c2_60, %c32_61] : memref<4x290xf32, #tpu.memory_space<vmem>>, vector<2x256xf32>
    %c6 = arith.constant 6 : index
    %149 = memref.load %arg2[%c6] : memref<18xf32, #tpu.memory_space<smem>>
    %150 = vector.broadcast %149 : f32 to vector<2x256xf32>
    %151 = arith.mulf %150, %147 : vector<2x256xf32>
    %c15 = arith.constant 15 : index
    %152 = memref.load %arg2[%c15] : memref<18xf32, #tpu.memory_space<smem>>
    %153 = vector.broadcast %152 : f32 to vector<2x256xf32>
    %154 = arith.mulf %153, %148 : vector<2x256xf32>
    %155 = arith.addf %151, %154 : vector<2x256xf32>
    %156 = vector.broadcast %50 : vector<1x256xf32> to vector<2x256xf32>
    %157 = arith.mulf %156, %155 : vector<2x256xf32>
    %158 = arith.addf %146, %157 : vector<2x256xf32>
    %c0_62 = arith.constant 0 : index
    %c33 = arith.constant 33 : index
    %159 = vector.load %arg5[%c0_62, %c33] : memref<4x290xf32, #tpu.memory_space<vmem>>, vector<2x256xf32>
    %c2_63 = arith.constant 2 : index
    %c33_64 = arith.constant 33 : index
    %160 = vector.load %arg5[%c2_63, %c33_64] : memref<4x290xf32, #tpu.memory_space<vmem>>, vector<2x256xf32>
    %c7 = arith.constant 7 : index
    %161 = memref.load %arg2[%c7] : memref<18xf32, #tpu.memory_space<smem>>
    %162 = vector.broadcast %161 : f32 to vector<2x256xf32>
    %163 = arith.mulf %162, %159 : vector<2x256xf32>
    %c16_65 = arith.constant 16 : index
    %164 = memref.load %arg2[%c16_65] : memref<18xf32, #tpu.memory_space<smem>>
    %165 = vector.broadcast %164 : f32 to vector<2x256xf32>
    %166 = arith.mulf %165, %160 : vector<2x256xf32>
    %167 = arith.addf %163, %166 : vector<2x256xf32>
    %168 = vector.broadcast %61 : vector<1x256xf32> to vector<2x256xf32>
    %169 = arith.mulf %168, %167 : vector<2x256xf32>
    %170 = arith.addf %158, %169 : vector<2x256xf32>
    %c0_66 = arith.constant 0 : index
    %c34 = arith.constant 34 : index
    %171 = vector.load %arg5[%c0_66, %c34] : memref<4x290xf32, #tpu.memory_space<vmem>>, vector<2x256xf32>
    %c2_67 = arith.constant 2 : index
    %c34_68 = arith.constant 34 : index
    %172 = vector.load %arg5[%c2_67, %c34_68] : memref<4x290xf32, #tpu.memory_space<vmem>>, vector<2x256xf32>
    %c8 = arith.constant 8 : index
    %173 = memref.load %arg2[%c8] : memref<18xf32, #tpu.memory_space<smem>>
    %174 = vector.broadcast %173 : f32 to vector<2x256xf32>
    %175 = arith.mulf %174, %171 : vector<2x256xf32>
    %c17_69 = arith.constant 17 : index
    %176 = memref.load %arg2[%c17_69] : memref<18xf32, #tpu.memory_space<smem>>
    %177 = vector.broadcast %176 : f32 to vector<2x256xf32>
    %178 = arith.mulf %177, %172 : vector<2x256xf32>
    %179 = arith.addf %175, %178 : vector<2x256xf32>
    %180 = vector.broadcast %72 : vector<1x256xf32> to vector<2x256xf32>
    %181 = arith.mulf %180, %179 : vector<2x256xf32>
    %182 = arith.addf %170, %181 : vector<2x256xf32>
    %183 = arith.negf %182 : vector<2x256xf32>
    %184 = math.exp %183 : vector<2x256xf32>
    %cst_70 = arith.constant 1.000000e+00 : f32
    %185 = vector.broadcast %cst_70 : f32 to vector<2x256xf32>
    %186 = arith.addf %185, %184 : vector<2x256xf32>
    %187 = arith.divf %185, %186 : vector<2x256xf32>
    %c0_71 = arith.constant 0 : index
    %c0_72 = arith.constant 0 : index
    %188 = vector.load %arg4[%c0_71, %c0_72] : memref<2x256xf32, #tpu.memory_space<vmem>>, vector<2x256xf32>
    tpu.vector_store %arg4[%c0_71, %c0_72], %187 {strides = array<i32>} : memref<2x256xf32, #tpu.memory_space<vmem>>, vector<2x256xf32>,
    return
  }
  func.func @transform_0(%arg0: i32) -> (i32, i32, i32) {
    %c0_i32 = arith.constant 0 : i32
    %c0_i32_0 = arith.constant 0 : i32
    %c0_i32_1 = arith.constant 0 : i32
    return %arg0, %c0_i32, %c0_i32_0 : i32, i32, i32
  }
  func.func @transform_1(%arg0: i32) -> i32 {
    %c0_i32 = arith.constant 0 : i32
    %c0_i32_0 = arith.constant 0 : i32
    return %c0_i32 : i32
  }
  func.func @transform_2(%arg0: i32) -> i32 {
    %c0_i32 = arith.constant 0 : i32
    %c0_i32_0 = arith.constant 0 : i32
    return %c0_i32 : i32
  }
  func.func @transform_3(%arg0: i32) -> (i32, i32) {
    %c0_i32 = arith.constant 0 : i32
    %c0_i32_0 = arith.constant 0 : i32
    return %arg0, %c0_i32 : i32, i32
  }
}

</mosaic_0001>

<bundles_post_ra>
// kernel: tpu_custom_call.1
= control target key start
LH: loop header
LB: loop body
LE: loop exit
PB: predicated region body
PF: predicated region fallthrough
CT: control target
= control target key end

     0   :  { %9 = vsyncpa [#allocation5], 0  ;;  %s968_s0 = inlined_call_operand.hbm [shape: f32[2,4,256], index: 0, kind: input, shape index: {}]   ;;  %s969_s1 = inlined_call_operand.vmem [shape: f32[18], index: 1, kind: input, shape index: {}]   ;;  %s970_s2 = inlined_call_operand.<no memory space> [shape: f32[1], index: 2, kind: input, shape index: {}]   ;;  %s971_s3 = inlined_call_operand.hbm [shape: f32[2,256], index: 3, kind: output, shape index: {}]  }
   0x1   :  { %10 = vsyncpa [#allocation7], 0 }
   0x2   :  { %11 = vsyncpa [#allocation6], 0  ;;  %s786_s12 = smov [#allocation4]   ;;  %s30_s16 = sshll.u32 %s969_s1, 4  ;;  %s31_s16 = int_to_ptr.vmem [resolvable:$true] %s30_s16 }
   0x3   :  { %s17_s13 = sshll.u32 %s786_s12, 4  ;;  %s18_s13 = int_to_ptr.vmem [resolvable:$true] %s17_s13 }
   0x4   :  { %s736_s17 = scalar_lea.vmem %s18_s13, 256  ;;  %p741_p1 = scmp.lt.s32.totalorder %s18_s13, %s18_s13 }
   0x5   :  { %p737_p0 = scmp.ne.s32.totalorder %s18_s13, %s736_s17  ;;  %p742_p2 = scmp.lt.s32.totalorder %s736_s17, %s736_s17 }
   0x7   :  { %p743_p3 = por %p742_p2, %p741_p1 }
   0x9   :  { %p744_p4 = pnand %p743_p3, %p737_p0 }
   0xb   :  { %747 = shalt.err (!%p744_p4)
}
   0xc   :  { %s787_s18 = smov 128   ;;  %s788_s19 = smov 8  }
   0xd   :  { %23 = dma.hbm_to_vmem [thread:$0]  %s968_s0, 256, %s18_s13, [#allocation5], %s787_s18, %s787_s18, %s788_s19  }
   0xe   :  { %s748_s22 = scalar_lea.vmem %s31_s16, 16  ;;  %p753_p6 = scmp.lt.s32.totalorder %s31_s16, %s31_s16 }
   0xf   :  { %p749_p5 = scmp.ne.s32.totalorder %s31_s16, %s748_s22  ;;  %p754_p7 = scmp.lt.s32.totalorder %s748_s22, %s748_s22 }
  0x11   :  { %p755_p8 = por %p754_p7, %p753_p6 }
  0x13   :  { %p756_p9 = pnand %p755_p8, %p749_p5 }
  0x15   :  { %759 = shalt.err (!%p756_p9)
}
  0x16   :  { %s789_s1 = smov [#allocation8]  }
  0x17   :  { %33 = dma.vmem_to_smem %s31_s16, 16, %s789_s1, [#allocation7]  }
  0x18   :  { %780 = dma.done.wait [#allocation5], 256  }
  0x19   :  { %781 = vsyncadd [#allocation5], 4294967040 }
  0x1a   :  { %782 = dma.done.wait [#allocation7], 16  }
  0x1b   :  { %783 = vsyncadd [#allocation7], 4294967280 }
  0x1c   :  { %42 = sfence }
  0x1d   :  { %vm47_vm0 = vcmask 1043456   ;;  %v85_v0 = vlaneseq  ;;  %v132_v1 = vld [vmem:[#allocation4 + $0x8] sm:$0xff]  ;;  %v43_v2 = vld [vmem:[#allocation4] sm:$0xff]  ;;  %v790_v3 = vmov 1966171168   ;;  %s791_s0 = smov 17  }
  0x1e   :  { %v83_v4 = vunpack.c.l.s4 %v790_v3  ;;  %v134_v5 = vcombine.high %v132_v1, %v132_v1  ;;  %v136_v6 = vsel %vm47_vm0, %v132_v1, -inf  ;;  %v45_v7 = vcombine.high %v43_v2, %v43_v2  ;;  %s850_s23 = sld [smem:[#allocation8 + $0x2]]  ;;  %s793_s6 = smov 126  }
  0x1f   :  { %v137_v8 = vrot.slane %v136_v6, 4  ;;  %v48_v9 = vsel %vm47_vm0, %v43_v2, -inf  ;;  %v150_v10 = vsel %vm47_vm0, %v132_v1, 0.0  ;;  %v86_v11 = vshrl.u32 %v85_v0, 7  ;;  %s672_s24 = sld [smem:[#allocation8 + $0xb]]  ;;  %s794_s8 = smov 127  }
  0x20   :  { %v143_v12 = vsel %vm47_vm0, %v134_v5, -inf  ;;  %v49_v13 = vrot.slane %v48_v9, 4  ;;  %v55_v14 = vsel %vm47_vm0, %v45_v7, -inf  ;;  %v151_v18 = vrot.slane %v150_v10, 4  ;;  %s855_s25 = sld [smem:[#allocation8 + $0xa]]  ;;  %s795_s12 = smov 111  }
  0x21   :  { %v138_v15 = vmax.f32 %v136_v6, %v137_v8  ;;  %v144_v16 = vrot.slane %v143_v12, 4  ;;  %v56_v17 = vrot.slane %v55_v14, 4  ;;  %v84_v19 = vunpack.c.0.s8 %v83_v4  ;;  %s859_s26 = sld [smem:[#allocation8 + $0x1]]  ;;  %s796_s14 = smov 112  }
  0x22   :  { %v50_v20 = vmax.f32 %v48_v9, %v49_v13  ;;  %v157_v21 = vsel %vm47_vm0, %v134_v5, 0.0  ;;  %v62_v22 = vsel %vm47_vm0, %v43_v2, 0.0  ;;  %v152_v26 = vadd.f32 %v151_v18, %v150_v10  ;;  %s863_s27 = sld [smem:[#allocation8 + $0xd]]  ;;  %s797_s16 = smov 96  }
  0x23   :  { %v139_v23 = vrot.slane %v138_v15, 2  ;;  %v145_v24 = vmax.f32 %v143_v12, %v144_v16  ;;  %v57_v25 = vmax.f32 %v55_v14, %v56_v17  ;;  %v158_v28 = vrot.slane %v157_v21, 4  ;;  %s865_s28 = sld [smem:[#allocation8 + $0xc]]  ;;  %s798_s17 = smov 110  }
  0x24   :  { %v51_v27 = vrot.slane %v50_v20, 2  ;;  %v63_v29 = vrot.slane %v62_v22, 4  ;;  %v69_v30 = vsel %vm47_vm0, %v45_v7, 0.0  ;;  %v153_v34 = vrot.slane %v152_v26, 2  ;;  %s867_s29 = sld [smem:[#allocation8 + $0x4]]  ;;  %s799_s18 = smov 94  }
  0x25   :  { %v140_v31 = vmax.f32 %v138_v15, %v139_v23  ;;  %v146_v32 = vrot.slane %v145_v24, 2  ;;  %v58_v33 = vrot.slane %v57_v25, 2  ;;  %v159_v36 = vadd.f32 %v158_v28, %v157_v21  ;;  %s870_s30 = sld [smem:[#allocation8 + $0x3]]  ;;  %s800_s19 = smov 95  }
  0x26   :  { %v52_v35 = vmax.f32 %v50_v20, %v51_v27  ;;  %v64_v37 = vadd.f32 %v63_v29, %v62_v22  ;;  %v70_v38 = vrot.slane %v69_v30, 4  ;;  %v154_v42 = vadd.f32 %v153_v34, %v152_v26  ;;  %s876_s4 = sld [smem:[#allocation8 + $0xf]] }
  0x27   :  { %v141_v39 = vrot.slane %v140_v31, 1  ;;  %v147_v40 = vmax.f32 %v145_v24, %v146_v32  ;;  %v59_v41 = vmax.f32 %v57_v25, %v58_v33  ;;  %v160_v44 = vrot.slane %v159_v36, 2  ;;  %s878_s5 = sld [smem:[#allocation8 + $0xe]] }
  0x28   :  { %v53_v43 = vrot.slane %v52_v35, 1  ;;  %v65_v45 = vrot.slane %v64_v37, 2  ;;  %v71_v46 = vadd.f32 %v70_v38, %v69_v30  ;;  %v155_v50 = vrot.slane %v154_v42, 1  ;;  %s886_s7 = sld [smem:[#allocation8 + $0x6]] }
  0x29   :  { %v142_v47 = vmax.f32 %v140_v31, %v141_v39  ;;  %v148_v48 = vrot.slane %v147_v40, 1  ;;  %v60_v49 = vrot.slane %v59_v41, 1  ;;  %v161_v52 = vadd.f32 %v160_v44, %v159_v36  ;;  %s891_s9 = sld [smem:[#allocation8 + $0x5]] }
  0x2a   :  { %v54_v51 = vmax.f32 %v52_v35, %v53_v43  ;;  %v66_v53 = vadd.f32 %v65_v45, %v64_v37  ;;  %v72_v54 = vrot.slane %v71_v46, 2  ;;  %v87_v55 = vsub.s32 %v84_v19, %v86_v11  ;;  %s895_s10 = sld [smem:[#allocation8 + $0x11]] }
  0x2b   :  { %v149_v56 = vmax.f32 %v147_v40, %v148_v48  ;;  %v61_v57 = vmax.f32 %v59_v41, %v60_v49  ;;  %v156_v58 = vadd.f32 %v155_v50, %v154_v42  ;;  %v162_v59 = vrot.slane %v161_v52, 1  ;;  %s899_s11 = sld [smem:[#allocation8 + $0x10]] }
  0x2c   :  { %v67_v60 = vrot.slane %v66_v53, 1  ;;  %v73_v61 = vadd.f32 %v72_v54, %v71_v46  ;;  %vm103_vm1 = vcmp.ge.s32.totalorder %v85_v0, 17  ;;  %vm104_vm2 = vcmp.lt.s32.totalorder %v85_v0, 273  ;;  %s908_s13 = sld [smem:[#allocation8 + $0x8]] }
  0x2d   :  { %v168_v62 = vcombine.low %v142_v47, %v149_v56  ;;  %v81_v63 = vcombine.low %v54_v51, %v61_v57  ;;  %v163_v1 = vadd.f32 %v162_v59, %v161_v52  ;;  %v164_v2 = vmul.f32 0.25, %v156_v58  ;;  %vm839_vm4 = vmand %vm103_vm1, %vm104_vm2  ;;  %s913_s15 = sld [smem:[#allocation8 + $0x7]] }
  0x2e   :  { %v68_v3 = vadd.f32 %v67_v60, %v66_v53  ;;  %v74_v4 = vrot.slane %v73_v61, 1  ;;  %vm99_vm3 = vcmask 138240   ;;  %vm214_vm5 = vcmask 134144   ;;  %s665_s20 = sld [smem:[#allocation8 + $0x9]] }
  0x2f   :  { %v175_v5 = vrot.slane %v168_v62, %v87_v55  ;;  %v88_v6 = vrot.slane %v81_v63, %v87_v55  ;;  %v165_v7 = vmul.f32 0.25, %v163_v1  ;;  %vm216_vm6 = vcmask 273544   ;;  %s283_s21 = sld [smem:[#allocation8]] }
  0x30   :  { %v75_v8 = vadd.f32 %v74_v4, %v73_v61  ;;  %v77_v9 = vmul.f32 0.25, %v68_v3  ;;  %v792_v32 = vmov 0.0   ;;  %v350_v33 = vstv %s672_s24 }
  0x31   :  { %v182_v10 = vrot.slane %v175_v5, %v87_v55  ;;  %v95_v12 = vrot.slane %v88_v6, %v87_v55  ;;  %v192_v11 = vcombine.low %v164_v2, %v165_v7  ;;  %v310_v34 = vstv %s855_s25 }
  0x32   :  { %v78_v13 = vmul.f32 0.25, %v75_v8  ;;  %v346_v37 = vstv %s850_s23  ;;  %v306_v41 = vstv %s859_s26  ;;  %v430_v48 = vstv %s863_s27 }
  0x33   :  { %183 = vrot.lane.b32.xlu1 %v182_v10, %s791_s0  ;;  %96 = vrot.lane.b32.xlu0 %v95_v12, %s791_s0  ;;  %v199_v14 = vrot.slane %v192_v11, %v87_v55  ;;  %v390_v49 = vstv %s865_s28  ;;  %v426_v8 = vstv %s867_s29  ;;  %vm332_vm9 = vcmask 1039360  }
  0x34   :  { %v109_v15 = vcombine.low %v77_v9, %v78_v13  ;;  %v386_v13 = vstv %s870_s30  ;;  %vm372_vm12 = vcmask 1031168   ;;  %vm412_vm13 = vcmask 916480  }
  0x35   :  { %v206_v16 = vrot.slane %v199_v14, %v87_v55  ;;  %vm492_vm14 = vcmask 900096   ;;  %vm452_vm15 = vcmask 908288   ;;  %vm532_vm0 = vcmask 785408  }
  0x36   :  { %v116_v17 = vrot.slane %v109_v15, %v87_v55  ;;  %vm572_vm1 = vcmask 777216   ;;  %vm612_vm2 = vcmask 769024  }
  0x37   :  { %207 = vrot.lane.b32.xlu1 %v206_v16, %s791_s0 }
  0x38   :  { %v123_v18 = vrot.slane %v116_v17, %v87_v55  ;;  %v510_v17 = vstv %s876_s4 }
  0x3a   :  { %124 = vrot.lane.b32.xlu0 %v123_v18, %s791_s0 }
  0xa5   :  { %v184_v19 = vpop.permute.xlu1 %183  ;;  %v97_v20 = vpop.permute.xlu0 %96 }
  0xa6   :  { %v185_v22 = vrot.slane %v184_v19, 7  ;;  %v98_v23 = vrot.slane %v97_v20, 7 }
  0xa8   :  { %v186_v24 = vsel %vm99_vm3, %v185_v22, %v184_v19  ;;  %v100_v25 = vsel %vm99_vm3, %v98_v23, %v97_v20  ;;  %v470_v22 = vstv %s878_s5 }
  0xa9   :  { %189 = vst.msk [vmem:[#allocation2 + $0x1] ss:$4 sm:$0x7] %vm839_vm4, %v186_v24  ;;  %106 = vst.msk [vmem:[#allocation2] ss:$4 sm:$0x7] %vm839_vm4, %v100_v25  ;;  %v208_v26 = vpop.permute.xlu1 %207 }
  0xaa   :  { %v209_v27 = vrot.slane %v208_v26, 7 }
  0xac   :  { %v125_v28 = vpop.permute.xlu0 %124  ;;  %v210_v29 = vsel %vm99_vm3, %v209_v27, %v208_v26 }
  0xad   :  { %v126_v30 = vrot.slane %v125_v28, 7  ;;  %213 = vst.msk [vmem:[#allocation2 + $0x3] ss:$4 sm:$0x7] %vm839_vm4, %v210_v29 }
  0xaf   :  { %v127_v31 = vsel %vm99_vm3, %v126_v30, %v125_v28 }
  0xb0   :  { %130 = vst.msk [vmem:[#allocation2 + $0x2] ss:$4 sm:$0x7] %vm839_vm4, %v127_v31 }
  0xb1   :  { %215 = vst.msk [vmem:[#allocation2] sm:$0xf] %vm214_vm5, %v792_v32 }
  0xb2   :  { %217 = vst.msk [vmem:[#allocation2 + $0x8] sm:$0xf] %vm216_vm6, %v792_v32 }
  0xb8   :  { %v341_v35 = vld [vmem:[#allocation2] sm:$0x33]  ;;  %v343_v36 = vld [vmem:[#allocation2] sm:$0xcc] }
  0xb9   :  { %v301_v38 = vld [vmem:[#allocation2] sm:$0x33]  ;;  %v351_v39 = vmul.f32 %v350_v33, %v343_v36  ;;  %v303_v40 = vld [vmem:[#allocation2] sm:$0xcc]  ;;  %v342_v42 = vld [vmem:[#allocation2 + $0x8] sm:$0x3]  ;;  %v347_v50 = vmul.f32 %v346_v37, %v341_v35 }
  0xba   :  { %v344_v43 = vld [vmem:[#allocation2 + $0x8] sm:$0xc]  ;;  %v311_v44 = vmul.f32 %v310_v34, %v303_v40  ;;  %v302_v46 = vld [vmem:[#allocation2 + $0x8] sm:$0x3]  ;;  %v348_v52 = vmul.f32 %v346_v37, %v342_v42  ;;  %v423_v54 = vld [vmem:[#allocation2] sm:$0xcc]  ;;  %v307_v55 = vmul.f32 %v306_v41, %v301_v38  ;;  %v506_v37 = vstv %s886_s7 }
  0xbb   :  { %v352_v45 = vmul.f32 %v350_v33, %v344_v43  ;;  %v304_v47 = vld [vmem:[#allocation2 + $0x8] sm:$0xc]  ;;  %v673_v51 = vrot.slane %v351_v39, 10  ;;  %v308_v58 = vmul.f32 %v306_v41, %v302_v46  ;;  %v383_v59 = vld [vmem:[#allocation2] sm:$0xcc]  ;;  %v431_v62 = vmul.f32 %v430_v48, %v423_v54 }
  0xbc   :  { %v312_v53 = vmul.f32 %v310_v34, %v304_v47  ;;  %v669_v56 = vrot.slane %v311_v44, 10  ;;  %v424_v63 = vld [vmem:[#allocation2 + $0x8] sm:$0xc]  ;;  %v391_v2 = vmul.f32 %v390_v49, %v383_v59  ;;  %v421_v7 = vld [vmem:[#allocation2] sm:$0x33]  ;;  %v466_v42 = vstv %s891_s9 }
  0xbd   :  { %v674_v57 = vrot.slane %v352_v45, 10  ;;  %v880_v60 = vadd.f32 %v673_v51, %v347_v50  ;;  %v384_v3 = vld [vmem:[#allocation2 + $0x8] sm:$0xc]  ;;  %v432_v5 = vmul.f32 %v430_v48, %v424_v63  ;;  %v422_v9 = vld [vmem:[#allocation2 + $0x8] sm:$0x3]  ;;  %v681_v12 = vrot.slane %v431_v62, 10 }
  0xbe   :  { %v670_v61 = vrot.slane %v312_v53, 10  ;;  %v882_v1 = vadd.f32 %v669_v56, %v307_v55  ;;  %v392_v10 = vmul.f32 %v390_v49, %v384_v3  ;;  %v381_v11 = vld [vmem:[#allocation2] sm:$0x33]  ;;  %v382_v14 = vld [vmem:[#allocation2 + $0x8] sm:$0x3]  ;;  %v677_v15 = vrot.slane %v391_v2, 10 }
  0xbf   :  { %366 = vrot.lane.b32.xlu1 %v880_v60, %s793_s6  ;;  %v362_v4 = vadd.f32 %v674_v57, %v348_v52  ;;  %v503_v16 = vld [vmem:[#allocation2] sm:$0xcc]  ;;  %v427_v18 = vmul.f32 %v426_v8, %v421_v7  ;;  %v428_v19 = vmul.f32 %v426_v8, %v422_v9  ;;  %v682_v20 = vrot.slane %v432_v5, 10  ;;  %v504_v26 = vld [vmem:[#allocation2 + $0x8] sm:$0xc] }
  0xc0   :  { %326 = vrot.lane.b32.xlu0 %v882_v1, %s794_s8  ;;  %v322_v6 = vadd.f32 %v670_v61, %v308_v58  ;;  %v463_v21 = vld [vmem:[#allocation2] sm:$0xcc]  ;;  %v387_v23 = vmul.f32 %v386_v13, %v381_v11  ;;  %v388_v24 = vmul.f32 %v386_v13, %v382_v14  ;;  %v678_v25 = vrot.slane %v392_v10, 10  ;;  %v464_v29 = vld [vmem:[#allocation2 + $0x8] sm:$0xc] }
  0xc1   :  { %v902_v27 = vadd.f32 %v681_v12, %v427_v18  ;;  %v511_v28 = vmul.f32 %v510_v17, %v503_v16  ;;  %v471_v31 = vmul.f32 %v470_v22, %v463_v21  ;;  %v442_v33 = vadd.f32 %v682_v20, %v428_v19  ;;  %v501_v36 = vld [vmem:[#allocation2] sm:$0x33]  ;;  %v502_v38 = vld [vmem:[#allocation2 + $0x8] sm:$0x3]  ;;  %v583_v45 = vld [vmem:[#allocation2] sm:$0xcc] }
  0xc2   :  { %v904_v30 = vadd.f32 %v677_v15, %v387_v23  ;;  %v512_v34 = vmul.f32 %v510_v17, %v504_v26  ;;  %v402_v35 = vadd.f32 %v678_v25, %v388_v24  ;;  %v472_v39 = vmul.f32 %v470_v22, %v464_v29  ;;  %v461_v41 = vld [vmem:[#allocation2] sm:$0x33]  ;;  %v462_v43 = vld [vmem:[#allocation2 + $0x8] sm:$0x3]  ;;  %v543_v50 = vld [vmem:[#allocation2] sm:$0xcc] }
  0xc3   :  { %370 = vrot.lane.b32.xlu1 %v362_v4, %s793_s6  ;;  %v689_v40 = vrot.slane %v511_v28, 10  ;;  %v685_v44 = vrot.slane %v471_v31, 10  ;;  %v590_v46 = vstv %s895_s10  ;;  %v507_v47 = vmul.f32 %v506_v37, %v501_v36  ;;  %v544_v57 = vld [vmem:[#allocation2 + $0x8] sm:$0xc]  ;;  %v581_v63 = vld [vmem:[#allocation2] sm:$0x33] }
  0xc4   :  { %330 = vrot.lane.b32.xlu0 %v322_v6, %s794_s8  ;;  %v508_v48 = vmul.f32 %v506_v37, %v502_v38  ;;  %v690_v49 = vrot.slane %v512_v34, 10  ;;  %v550_v51 = vstv %s899_s11  ;;  %v467_v52 = vmul.f32 %v466_v42, %v461_v41  ;;  %v541_v5 = vld [vmem:[#allocation2] sm:$0x33]  ;;  %v542_v7 = vld [vmem:[#allocation2 + $0x8] sm:$0x3] }
  0xc5   :  { %v468_v53 = vmul.f32 %v466_v42, %v462_v43  ;;  %v686_v54 = vrot.slane %v472_v39, 10  ;;  %v521_v55 = vadd.f32 %v689_v40, %v507_v47  ;;  %v591_v56 = vmul.f32 %v590_v46, %v583_v45  ;;  %v584_v17 = vld [vmem:[#allocation2 + $0x8] sm:$0xc]  ;;  %v582_v21 = vld [vmem:[#allocation2 + $0x8] sm:$0x3] }
  0xc6   :  { %v481_v58 = vadd.f32 %v685_v44, %v467_v52  ;;  %v551_v59 = vmul.f32 %v550_v51, %v543_v50  ;;  %v522_v61 = vadd.f32 %v690_v49, %v508_v48  ;;  %v586_v2 = vstv %s908_s13  ;;  %v282_v37 = vld [vmem:[#allocation2] sm:$0xcc] }
  0xc7   :  { %446 = vrot.lane.b32.xlu1 %v902_v27, %s795_s12  ;;  %v482_v62 = vadd.f32 %v686_v54, %v468_v53  ;;  %v552_v3 = vmul.f32 %v550_v51, %v544_v57  ;;  %v697_v4 = vrot.slane %v591_v56, 10  ;;  %v546_v6 = vstv %s913_s15 }
  0xc8   :  { %406 = vrot.lane.b32.xlu0 %v904_v30, %s796_s14  ;;  %v693_v8 = vrot.slane %v551_v59, 10  ;;  %v587_v9 = vmul.f32 %v586_v2, %v581_v63  ;;  %v547_v10 = vmul.f32 %v546_v6, %v541_v5  ;;  %v548_v12 = vmul.f32 %v546_v6, %v542_v7 }
  0xc9   :  { %v694_v11 = vrot.slane %v552_v3, 10  ;;  %v325_v16 = vcombine.high %v882_v1, %v882_v1  ;;  %v405_v18 = vcombine.high %v904_v30, %v904_v30  ;;  %v365_v19 = vcombine.high %v880_v60, %v880_v60 }
  0xca   :  { %v601_v13 = vadd.f32 %v697_v4, %v587_v9  ;;  %v561_v14 = vadd.f32 %v693_v8, %v547_v10  ;;  %v592_v20 = vmul.f32 %v590_v46, %v584_v17  ;;  %v485_v22 = vcombine.high %v481_v58, %v481_v58  ;;  %v281_v46 = vld [vmem:[#allocation2] sm:$0x33] }
  0xcb   :  { %450 = vrot.lane.b32.xlu1 %v442_v33, %s795_s12  ;;  %v562_v15 = vadd.f32 %v694_v11, %v548_v12  ;;  %v445_v1 = vcombine.high %v902_v27, %v902_v27  ;;  %v588_v23 = vmul.f32 %v586_v2, %v582_v21  ;;  %v525_v26 = vcombine.high %v521_v55, %v521_v55 }
  0xcc   :  { %410 = vrot.lane.b32.xlu0 %v402_v35, %s796_s14  ;;  %v698_v24 = vrot.slane %v592_v20, 10  ;;  %v565_v25 = vcombine.high %v561_v14, %v561_v14  ;;  %v605_v28 = vcombine.high %v601_v13, %v601_v13  ;;  %v219_v33 = vand.u32 127, %v85_v0 }
  0xcd   :  { %v287_v36 = vstv %s665_s20  ;;  %v284_v45 = vstv %s283_s21  ;;  %v280_v4 = vstv %s970_s2  ;;  %s801_s2 = smov [#allocation9]  }
  0xce   :  { %v602_v60 = vadd.f32 %v698_v24, %v588_v23  ;;  %v220_v38 = vadd.s32 128, %v219_v33  ;;  %v288_v41 = vmul.f32 %v287_v36, %v282_v37  ;;  %v225_v42 = vand.u32 15, %v219_v33  ;;  %s651_s0 = sshll.u32 %s801_s2, 4  ;;  %s652_s0 = int_to_ptr.vmem [resolvable:$true] %s651_s0 }
  0xcf   :  { %526 = vrot.lane.b32.xlu1 %v521_v55, %s797_s16  ;;  %v285_v50 = vmul.f32 %v284_v45, %v281_v46  ;;  %s760_s23 = scalar_lea.vmem %s652_s0, 64  ;;  %p765_p11 = scmp.lt.s32.totalorder %s652_s0, %s652_s0 }
  0xd0   :  { %486 = vrot.lane.b32.xlu0 %v481_v58, %s798_s17  ;;  %v232_v43 = vand.u32 15, %v220_v38  ;;  %v666_v48 = vrot.slane %v288_v41, 10  ;;  %v245_v0 = vadd.s32 4294967295, %v225_v42  ;;  %v267_v57 = vadd.s32 1, %v225_v42  ;;  %p761_p10 = scmp.ne.s32.totalorder %s652_s0, %s760_s23  ;;  %p766_p12 = scmp.lt.s32.totalorder %s760_s23, %s760_s23 }
  0xd2   :  { %v246_v49 = vadd.s32 4294967295, %v232_v43  ;;  %v293_v53 = vadd.f32 %v666_v48, %v285_v50  ;;  %vm247_vm7 = vcmp.ge.s32.totalorder %v245_v0, 0  ;;  %v268_v58 = vadd.s32 1, %v232_v43  ;;  %p767_p13 = por %p766_p12, %p765_p11 }
  0xd3   :  { %530 = vrot.lane.b32.xlu1 %v522_v61, %s797_s16  ;;  %v661_v59 = vsel %vm247_vm7, 1.0, %v792_v32  ;;  %vm271_vm10 = vcmp.lt.s32.totalorder %v267_v57, 16 }
  0xd4   :  { %490 = vrot.lane.b32.xlu0 %v482_v62, %s798_s17  ;;  %vm248_vm8 = vcmp.ge.s32.totalorder %v246_v49, 0  ;;  %v295_v56 = vcombine.high %v293_v53, %v293_v53  ;;  %v297_v2 = vmul.f32 %v661_v59, %v293_v53  ;;  %vm272_vm11 = vcmp.lt.s32.totalorder %v268_v58, 16  ;;  %p768_p0 = pnand %p767_p13, %p761_p10 }
  0xd5   :  { %v662_v61 = vsel %vm248_vm8, 1.0, %v792_v32  ;;  %v663_v7 = vsel %vm271_vm10, 1.0, %v792_v32  ;;  %v664_v8 = vsel %vm272_vm11, 1.0, %v792_v32 }
  0xd6   :  { %v298_v3 = vmul.f32 %v662_v61, %v295_v56  ;;  %v299_v10 = vadd.f32 %v297_v2, %v280_v4 }
  0xd7   :  { %606 = vrot.lane.b32.xlu1 %v601_v13, %s799_s18 }
  0xd8   :  { %566 = vrot.lane.b32.xlu0 %v561_v14, %s800_s19  ;;  %v300_v12 = vadd.f32 %v298_v3, %v280_v4 }
  0xdb   :  { %328 = vrot.lane.b32.xlu1 %v325_v16, %s794_s8 }
  0xdc   :  { %570 = vrot.lane.b32.xlu0 %v562_v15, %s800_s19 }
  0xdf   :  { %408 = vrot.lane.b32.xlu1 %v405_v18, %s796_s14 }
  0xe0   :  { %368 = vrot.lane.b32.xlu0 %v365_v19, %s793_s6 }
  0xe3   :  { %488 = vrot.lane.b32.xlu1 %v485_v22, %s798_s17 }
  0xe4   :  { %448 = vrot.lane.b32.xlu0 %v445_v1, %s795_s12 }
  0xe7   :  { %568 = vrot.lane.b32.xlu1 %v565_v25, %s800_s19 }
  0xe8   :  { %528 = vrot.lane.b32.xlu0 %v525_v26, %s797_s16 }
  0xeb   :  { %610 = vrot.lane.b32.xlu1 %v602_v60, %s799_s18 }
  0xec   :  { %608 = vrot.lane.b32.xlu0 %v605_v28, %s799_s18 }
 0x131   :  { %v367_v29 = vpop.permute.xlu1 %366 }
 0x132   :  { %v327_v30 = vpop.permute.xlu0 %326 }
 0x135   :  { %v371_v31 = vpop.permute.xlu1 %370 }
 0x136   :  { %v331_v27 = vpop.permute.xlu0 %330 }
 0x139   :  { %v941_v34 = vpop.permute.xlu1 %446 }
 0x13a   :  { %v407_v35 = vpop.permute.xlu0 %406 }
 0x13d   :  { %v943_v39 = vpop.permute.xlu1 %450 }
 0x13e   :  { %v411_v40 = vpop.permute.xlu0 %410 }
 0x141   :  { %v945_v44 = vpop.permute.xlu1 %526 }
 0x142   :  { %v487_v47 = vpop.permute.xlu0 %486 }
 0x145   :  { %v531_v51 = vpop.permute.xlu1 %530 }
 0x146   :  { %v491_v52 = vpop.permute.xlu0 %490 }
 0x149   :  { %v947_v54 = vpop.permute.xlu1 %606 }
 0x14a   :  { %v949_v55 = vpop.permute.xlu0 %566 }
 0x14d   :  { %v329_v62 = vpop.permute.xlu1 %328 }
 0x14e   :  { %v571_v63 = vpop.permute.xlu0 %570  ;;  %v333_v5 = vsel %vm332_vm9, %v327_v30, %v329_v62  ;;  %v334_v6 = vsel %vm332_vm9, %v329_v62, %v331_v27 }
 0x14f   :  { %v339_v17 = vadd.f32 %v333_v5, %v299_v10  ;;  %v340_v18 = vadd.f32 %v334_v6, %v300_v12 }
 0x151   :  { %v409_v9 = vpop.permute.xlu1 %408 }
 0x152   :  { %v369_v11 = vpop.permute.xlu0 %368  ;;  %v413_v15 = vsel %vm412_vm13, %v407_v35, %v409_v9  ;;  %v414_v16 = vsel %vm412_vm13, %v409_v9, %v411_v40 }
 0x153   :  { %v373_v13 = vsel %vm372_vm12, %v367_v29, %v369_v11  ;;  %v374_v14 = vsel %vm372_vm12, %v369_v11, %v371_v31  ;;  %v417_v23 = vmul.f32 %v661_v59, %v413_v15  ;;  %v418_v24 = vmul.f32 %v662_v61, %v414_v16 }
 0x154   :  { %v377_v19 = vmul.f32 %v663_v7, %v373_v13  ;;  %v378_v20 = vmul.f32 %v664_v8, %v374_v14 }
 0x155   :  { %v489_v21 = vpop.permute.xlu1 %488 }
 0x156   :  { %v379_v22 = vadd.f32 %v377_v19, %v339_v17  ;;  %v380_v1 = vadd.f32 %v378_v20, %v340_v18  ;;  %v449_v32 = vpop.permute.xlu0 %448  ;;  %v493_v25 = vsel %vm492_vm14, %v487_v47, %v489_v21  ;;  %v494_v26 = vsel %vm492_vm14, %v489_v21, %v491_v52 }
 0x157   :  { %v453_v29 = vsel %vm452_vm15, %v941_v34, %v449_v32  ;;  %v454_v30 = vsel %vm452_vm15, %v449_v32, %v943_v39  ;;  %v497_v35 = vmul.f32 %v663_v7, %v493_v25  ;;  %v498_v36 = vmul.f32 %v664_v8, %v494_v26 }
 0x158   :  { %v419_v60 = vadd.f32 %v417_v23, %v379_v22  ;;  %v420_v28 = vadd.f32 %v418_v24, %v380_v1 }
 0x159   :  { %v569_v31 = vpop.permute.xlu1 %568 }
 0x15a   :  { %v459_v27 = vadd.f32 %v453_v29, %v419_v60  ;;  %v460_v33 = vadd.f32 %v454_v30, %v420_v28  ;;  %v529_v37 = vpop.permute.xlu0 %528  ;;  %v573_v39 = vsel %vm572_vm1, %v949_v55, %v569_v31  ;;  %v574_v0 = vsel %vm572_vm1, %v569_v31, %v571_v63 }
 0x15b   :  { %v533_v38 = vsel %vm532_vm0, %v945_v44, %v529_v37  ;;  %v534_v40 = vsel %vm532_vm0, %v529_v37, %v531_v51 }
 0x15c   :  { %v499_v41 = vadd.f32 %v497_v35, %v459_v27  ;;  %v500_v42 = vadd.f32 %v498_v36, %v460_v33  ;;  %v537_v43 = vmul.f32 %v661_v59, %v533_v38  ;;  %v538_v45 = vmul.f32 %v662_v61, %v534_v40 }
 0x15d   :  { %v611_v46 = vpop.permute.xlu1 %610 }
 0x15e   :  { %v539_v47 = vadd.f32 %v537_v43, %v499_v41  ;;  %v540_v34 = vadd.f32 %v538_v45, %v500_v42  ;;  %v609_v48 = vpop.permute.xlu0 %608 }
 0x15f   :  { %v613_v49 = vsel %vm612_vm2, %v947_v54, %v609_v48  ;;  %v614_v50 = vsel %vm612_vm2, %v609_v48, %v611_v46 }
 0x160   :  { %v579_v52 = vadd.f32 %v573_v39, %v539_v47  ;;  %v580_v53 = vadd.f32 %v574_v0, %v540_v34  ;;  %v617_v44 = vmul.f32 %v663_v7, %v613_v49  ;;  %v618_v51 = vmul.f32 %v664_v8, %v614_v50 }
 0x162   :  { %v619_v56 = vadd.f32 %v617_v44, %v579_v52  ;;  %v620_v57 = vadd.f32 %v618_v51, %v580_v53 }
 0x164   :  { %v699_v58 = vmul.f32 -1.442695, %v619_v56  ;;  %v700_v62 = vmul.f32 -1.442695, %v620_v57 }
 0x166   :  { %720 = vpow2.f32 %v699_v58 }
 0x167   :  { %722 = vpow2.f32 %v700_v62 }
 0x173   :  { %v721_v59 = vpop.eup %720 }
 0x174   :  { %v723_v61 = vpop.eup %722  ;;  %v627_v2 = vadd.f32 1.0, %v721_v59 }
 0x175   :  { %v628_v3 = vadd.f32 1.0, %v723_v61 }
 0x176   :  { %724 = vrcp.f32 %v627_v2 }
 0x177   :  { %726 = vrcp.f32 %v628_v3 }
 0x183   :  { %v725_v54 = vpop.eup %724 }
 0x184   :  { %v727_v55 = vpop.eup %726 }
 0x185   :  { %v635_v63 = vcombine.low %v725_v54, %v727_v55 }
 0x187   :  { %701 = vst.sshfl [vmem:[#allocation9] sm:$0x33 pattern:$0x76325410] %v635_v63 }
 0x188   :  { %771 = shalt.err (!%p768_p0)
}
 0x189   :  { %654 = dma.vmem_to_hbm [thread:$0]  %s652_s0, 64, %s971_s3, [#allocation6]  }
 0x18a   :  { %784 = dma.done.wait [#allocation6], 64  }
 0x18b   :  { %785 = vsyncadd [#allocation6], 4294967232 }
 0x18c   :  { %658 = vsyncpa [#allocation5], 1 }
 0x18d   :  { %659 = vsyncpa [#allocation6], 1 }
 0x18e   :  { %660 = vsyncpa [#allocation7], 1 }

</bundles_post_ra>
